<compile_context>
chip_gen: v7x
topology: tpu7x:2x2x1
jax: 0.10.0
libtpu: 0.0.40
codegen_flags: <defaults>
</compile_context>

<pallas_src>
import jax
import jax.numpy as jnp
from jax import lax
from jax.experimental import pallas as pl
from jax.experimental.pallas import tpu as pltpu


# ----------------------------- kernel -------------------------------------- #

def _fused_kernel(lhs_ref, paug_ref, rhs_ref, pos_ref, neg_ref):
    # lhs_ref:  [tq, Daug]   augmented query rows (j-invariant block)
    # paug_ref: [tq, Daug]   augmented positive-target rows (j-invariant block)
    # rhs_ref:  [tn, Daug]   augmented negative-target rows
    # pos_ref:  [tq, 1]      neg_ref: [tq, tn]
    lhs = lhs_ref[...]

    # Entire negative tile = one lane-dense MXU matmul; bias / row / column terms are
    # already folded into the augmented operands, so there is no VPU epilogue at all.
    neg_ref[...] = lax.dot_general(
        lhs, rhs_ref[...], (((1,), (1,)), ((), ())),
        preferred_element_type=jnp.float32).astype(neg_ref.dtype)

    # Positive scores: once per query tile (first negative tile only).
    @pl.when(pl.program_id(1) == 0)
    def _():
        f = lhs.astype(jnp.float32) * paug_ref[...].astype(jnp.float32)   # [tq, Daug]
        pos_ref[...] = jnp.sum(f, axis=-1, keepdims=True).astype(pos_ref.dtype)


# ----------------------------- wrapper ------------------------------------- #

def _round_up(x, m):
    return ((x + m - 1) // m) * m


def mlp_classification_forward(query_embeds, pos_target_embeds, neg_target_embeds,
                               is_head_prediction, weight, bias, *,
                               add_batch_to_negs=False, tq_max=128, tn_max=1024,
                               out_dtype=jnp.float32):
    """Pallas equivalent of MLPClassificationLayer.forward.

    weight: [1, 4*D] (PyTorch nn.Linear layout), bias: [1].
    Returns (pos_scores [Q, 1], neg_scores [Q, N, 1]); N includes the Q extra
    negatives when add_batch_to_negs=True, matching the torch module.
    """
    q = jnp.asarray(query_embeds)
    p = jnp.asarray(pos_target_embeds)
    n = jnp.asarray(neg_target_embeds)
    if add_batch_to_negs:
        # add_pos_to_negs: every query also scores against all positive targets.
        n = jnp.concatenate([n, p], axis=0)

    Q, D = q.shape
    N = n.shape[0]

    # Keep the caller's bf16 for the MXU operands (halves DMA bytes, v5e MXU speedup);
    # otherwise compute in f32. Accumulation is always f32.
    compute_dtype = jnp.bfloat16 if q.dtype == jnp.bfloat16 else jnp.float32

    qf = q.astype(jnp.float32)
    pf = p.astype(jnp.float32)
    nf = n.astype(jnp.float32)

    # ---- fold the Linear(4D, 1) weight into the augmented operands (once, tiny) ---- #
    w = jnp.asarray(weight, jnp.float32).reshape(4 * D)
    w1, w2, w3, w4 = w[:D], w[D:2 * D], w[2 * D:3 * D], w[3 * D:]
    a = w1 + w3                                   # head coefficient
    c = w2 - w3                                   # tail coefficient
    b = jnp.asarray(bias, jnp.float32).reshape(())

    is_head = jnp.asarray(is_head_prediction).reshape(Q).astype(bool)
    head_sel = is_head.astype(jnp.float32)
    tail_sel = 1.0 - head_sel

    q_a = qf @ a                                  # [Q]
    q_c = qf @ c                                  # [Q]
    row_term = jnp.where(is_head, q_c, q_a) + b   # query-side term + bias, [Q]

    # Augmented LHS: [Q, D+3]  =  [q ⊙ w4 | head_sel | tail_sel | row_term + b]
    lhs = jnp.concatenate(
        [qf * w4, head_sel[:, None], tail_sel[:, None], row_term[:, None]], axis=-1)

    # Augmented targets: [X, D+3] = [x | x·a | x·c | 1]
    def _augment_target(x):
        return jnp.concatenate(
            [x, (x @ a)[:, None], (x @ c)[:, None],
             jnp.ones((x.shape[0], 1), jnp.float32)], axis=-1)

    paug = _augment_target(pf)                    # positives, [Q, D+3]
    rhs = _augment_target(nf)                     # negatives, [N, D+3]

    Daug = D + 3
    Daug_pad = _round_up(Daug, 8)                 # tidy lane tail (zero columns)

    # ---- tiling ---- #
    # Query axis: multiple of 8; ensure >= 2 blocks on the 'parallel' axis (v7x megacore).
    tq_max = max(8, _round_up(tq_max, 8))
    Q_pad = _round_up(Q, 8)
    if Q_pad <= tq_max:
        tq = Q_pad
    else:
        tq = tq_max
        Q_pad = _round_up(Q, tq)
    if Q_pad // tq == 1 and Q_pad >= 16:
        tq = _round_up((Q_pad + 1) // 2, 8)
        Q_pad = _round_up(Q_pad, tq)

    # Negatives axis: lane-dense (multiple of 128), large tiles; pick tn <= tn_max that
    # minimises padded columns (no fallback that shrinks tn to 128 for awkward N).
    tn_max = max(128, _round_up(tn_max, 128))
    N_min_pad = _round_up(N, 128)
    if N_min_pad <= tn_max:
        tn, N_pad = N_min_pad, N_min_pad
    else:
        tn, N_pad = None, None
        for cand in range(tn_max, 0, -128):
            cand_pad = _round_up(N, cand)
            if N_pad is None or cand_pad < N_pad:
                tn, N_pad = cand, cand_pad

    # Pad + cast the (small) augmented operands. These passes are O((Q+N)*D) and are
    # fused by XLA into the augmentation build; the kernel's [Q, N] output dominates.
    def _pad2(x, rows, cols):
        return jnp.pad(x, ((0, rows - x.shape[0]), (0, cols - x.shape[1])))

    lhs_p = _pad2(lhs, Q_pad, Daug_pad).astype(compute_dtype)
    paug_p = _pad2(paug, Q_pad, Daug_pad).astype(compute_dtype)
    rhs_p = _pad2(rhs, N_pad, Daug_pad).astype(compute_dtype)

    # Explicit VMEM budget (double-buffered) with headroom; also raises v5e's 16 MiB
    # scoped default and stays inside v7x's 64 MiB physical VMEM.
    in_isz = jnp.dtype(compute_dtype).itemsize
    out_isz = jnp.dtype(out_dtype).itemsize
    per_step = ((2 * tq + tn) * Daug_pad) * in_isz + tq * tn * out_isz + tq * 4
    vmem_limit = int(min(56 << 20, max(32 << 20, 3 * 2 * per_step)))

    grid = (Q_pad // tq, N_pad // tn)

    pos_out, neg_out = pl.pallas_call(
        _fused_kernel,
        out_shape=(jax.ShapeDtypeStruct((Q_pad, 1), jnp.float32),
                   jax.ShapeDtypeStruct((Q_pad, N_pad), out_dtype)),
        grid_spec=pltpu.PrefetchScalarGridSpec(
            num_scalar_prefetch=0,
            grid=grid,
            in_specs=[
                pl.BlockSpec((tq, Daug_pad), lambda i, j: (i, 0)),   # augmented queries
                pl.BlockSpec((tq, Daug_pad), lambda i, j: (i, 0)),   # augmented positives
                pl.BlockSpec((tn, Daug_pad), lambda i, j: (j, 0)),   # augmented negatives
            ],
            out_specs=[
                pl.BlockSpec((tq, 1), lambda i, j: (i, 0)),          # pos scores
                pl.BlockSpec((tq, tn), lambda i, j: (i, j)),         # neg scores (lane-dense)
            ],
        ),
        compiler_params=pltpu.CompilerParams(
            dimension_semantics=("parallel", "arbitrary"),
            vmem_limit_bytes=vmem_limit),
    )(lhs_p, paug_p, rhs_p)

    # TODO(synk): downstream callers that can consume padded [Q_pad, N_pad] scores should
    # skip this slice (it re-copies the score matrix whenever padding > 0).
    pos_scores = pos_out[:Q]                                   # [Q, 1]
    neg_scores = neg_out[:Q, :N][:, :, None]                   # [Q, N, 1]
    return pos_scores, neg_scores


# ----------------------------- reference ----------------------------------- #

def _reference(query, pos_target, neg_target, is_head, weight, bias):
    Q, D = query.shape
    m = is_head.reshape(-1, 1)
    head = jnp.where(m, pos_target, query)
    tail = jnp.where(m, query, pos_target)
    neg = jnp.broadcast_to(neg_target[None], (Q, neg_target.shape[0], D))
    qb = jnp.broadcast_to(query[:, None, :], neg.shape)
    m3 = is_head.reshape(-1, 1, 1)
    neg_head = jnp.where(m3, neg, qb)
    neg_tail = jnp.where(m3, qb, neg)
    pos_feat = jnp.concatenate([head, tail, head - tail, head * tail], axis=-1)
    neg_feat = jnp.concatenate(
        [neg_head, neg_tail, neg_head - neg_tail, neg_head * neg_tail], axis=-1)
    pos_scores = pos_feat @ weight.T + bias
    neg_scores = neg_feat @ weight.T + bias
    return pos_scores, neg_scores


# ------------------------------- main --------------------------------------- #

if __name__ == "__main__":
    base_key = jax.random.PRNGKey(0)

    # Configs exercise: aligned shapes, padding path (Q % 8 != 0, N % 128 != 0, odd D),
    # and the add_batch_to_negs path.
    for (num_q, num_negs, embed_dim, add_batch) in [(16, 16, 32, False),
                                                    (10, 20, 32, False),
                                                    (12, 24, 40, True)]:
        ks = jax.random.split(
            jax.random.fold_in(base_key, num_q * 10000 + num_negs * 10 + embed_dim), 6)
        k1, k2, k3, k4, k5, k6 = ks

        query_embeds = jax.random.normal(k1, (num_q, embed_dim), jnp.float32)
        pos_target_embeds = jax.random.normal(k2, (num_q, embed_dim), jnp.float32)
        neg_target_embeds = jax.random.normal(k3, (num_negs, embed_dim), jnp.float32)
        is_head_prediction = jax.random.bernoulli(k4, 0.5, (num_q,))

        # nn.Linear(4*embed_dim, 1) params, PyTorch-style uniform init bound.
        bound = 1.0 / (4 * embed_dim) ** 0.5
        weight = jax.random.uniform(k5, (1, 4 * embed_dim), jnp.float32, -bound, bound)
        bias = jax.random.uniform(k6, (1,), jnp.float32, -bound, bound)

        pos_scores, neg_scores = mlp_classification_forward(
            query_embeds, pos_target_embeds, neg_target_embeds,
            is_head_prediction, weight, bias, add_batch_to_negs=add_batch)
        jax.block_until_ready((pos_scores, neg_scores))

        ref_negs = (jnp.concatenate([neg_target_embeds, pos_target_embeds], axis=0)
                    if add_batch else neg_target_embeds)
        ref_pos, ref_neg = _reference(query_embeds, pos_target_embeds, ref_negs,
                                      is_head_prediction, weight, bias)

        n_total = num_negs + (num_q if add_batch else 0)
        assert pos_scores.shape == (num_q, 1)
        assert neg_scores.shape == (num_q, n_total, 1)
        assert jnp.allclose(pos_scores, ref_pos, atol=1e-4, rtol=1e-4)
        assert jnp.allclose(neg_scores, ref_neg, atol=1e-4, rtol=1e-4)

    print("KERNEL_OK")
</pallas_src>

<mosaic_0001>
module attributes {stable_mosaic.version = 11 : i64} {
  func.func @_fused_kernel(%arg0: i32, %arg1: i32, %arg2: memref<8x40xf32, #tpu.memory_space<vmem>>, %arg3: memref<8x40xf32, #tpu.memory_space<vmem>>, %arg4: memref<128x40xf32, #tpu.memory_space<vmem>>, %arg5: memref<8x1xf32, #tpu.memory_space<vmem>>, %arg6: memref<8x128xf32, #tpu.memory_space<vmem>>) attributes {dimension_semantics = [#tpu.dimension_semantics<parallel>, #tpu.dimension_semantics<arbitrary>], iteration_bounds = array<i64: 2, 1>, scalar_prefetch = 0 : i64, scratch_operands = 0 : i64, tpu.core_type = #tpu.core_type<tc>, window_params = [{transform_indices = @transform_0, window_bounds = array<i64: 8, 40>}, {transform_indices = @transform_1, window_bounds = array<i64: 8, 40>}, {transform_indices = @transform_2, window_bounds = array<i64: 128, 40>}, {transform_indices = @transform_3, window_bounds = array<i64: 8, 1>}, {transform_indices = @transform_4, window_bounds = array<i64: 8, 128>}]} {
    %c0 = arith.constant 0 : index
    %c0_0 = arith.constant 0 : index
    %0 = vector.load %arg2[%c0, %c0_0] : memref<8x40xf32, #tpu.memory_space<vmem>>, vector<8x40xf32>
    %c0_1 = arith.constant 0 : index
    %c0_2 = arith.constant 0 : index
    %1 = vector.load %arg4[%c0_1, %c0_2] : memref<128x40xf32, #tpu.memory_space<vmem>>, vector<128x40xf32>
    %cst = arith.constant dense<0.000000e+00> : vector<8x128xf32>
    %2 = tpu.matmul %0, %1, %cst {dimension_numbers = #tpu.dot_dimension_numbers<[1], [1], [0], [0], [0, 0, 1, 0], [], []>} : vector<8x40xf32>, vector<128x40xf32>, vector<8x128xf32> -> vector<8x128xf32>
    %c0_3 = arith.constant 0 : index
    %c0_4 = arith.constant 0 : index
    %3 = vector.load %arg6[%c0_3, %c0_4] : memref<8x128xf32, #tpu.memory_space<vmem>>, vector<8x128xf32>
    tpu.vector_store %arg6[%c0_3, %c0_4], %2 {strides = array<i32>} : memref<8x128xf32, #tpu.memory_space<vmem>>, vector<8x128xf32>,
    %c0_i32 = arith.constant 0 : i32
    %4 = arith.cmpi eq, %arg1, %c0_i32 : i32
    %5 = arith.extui %4 : i1 to i32
    %c0_i32_5 = arith.constant 0 : i32
    %6 = arith.cmpi ne, %5, %c0_i32_5 : i32
    scf.if %6 {
      %c0_6 = arith.constant 0 : index
      %c0_7 = arith.constant 0 : index
      %7 = vector.load %arg3[%c0_6, %c0_7] : memref<8x40xf32, #tpu.memory_space<vmem>>, vector<8x40xf32>
      %8 = arith.mulf %0, %7 : vector<8x40xf32>
      %cst_8 = arith.constant dense<0.000000e+00> : vector<8xf32>
      %9 = vector.multi_reduction <add>, %8, %cst_8 [1] : vector<8x40xf32> to vector<8xf32>
      %10 = vector.shape_cast %9 : vector<8xf32> to vector<8x1xf32>
      %c0_9 = arith.constant 0 : index
      %c0_10 = arith.constant 0 : index
      %11 = vector.load %arg5[%c0_9, %c0_10] : memref<8x1xf32, #tpu.memory_space<vmem>>, vector<8x1xf32>
      tpu.vector_store %arg5[%c0_9, %c0_10], %10 {strides = array<i32>} : memref<8x1xf32, #tpu.memory_space<vmem>>, vector<8x1xf32>,
    } else {
    }
    return
  }
  func.func @transform_0(%arg0: i32, %arg1: i32) -> (i32, i32) {
    %c0_i32 = arith.constant 0 : i32
    %c0_i32_0 = arith.constant 0 : i32
    return %arg0, %c0_i32 : i32, i32
  }
  func.func @transform_1(%arg0: i32, %arg1: i32) -> (i32, i32) {
    %c0_i32 = arith.constant 0 : i32
    %c0_i32_0 = arith.constant 0 : i32
    return %arg0, %c0_i32 : i32, i32
  }
  func.func @transform_2(%arg0: i32, %arg1: i32) -> (i32, i32) {
    %c0_i32 = arith.constant 0 : i32
    %c0_i32_0 = arith.constant 0 : i32
    return %arg1, %c0_i32 : i32, i32
  }
  func.func @transform_3(%arg0: i32, %arg1: i32) -> (i32, i32) {
    %c0_i32 = arith.constant 0 : i32
    %c0_i32_0 = arith.constant 0 : i32
    return %arg0, %c0_i32 : i32, i32
  }
  func.func @transform_4(%arg0: i32, %arg1: i32) -> (i32, i32) {
    %c0_i32 = arith.constant 0 : i32
    return %arg0, %arg1 : i32, i32
  }
}

</mosaic_0001>

<bundles_post_ra>
// kernel: tpu_custom_call.1
= control target key start
LH: loop header
LB: loop body
LE: loop exit
PB: predicated region body
PF: predicated region fallthrough
CT: control target
= control target key end

     0   :  { %10 = vsyncpa [#allocation3], 0  ;;  %s1026_s0 = inlined_call_operand.vmem [shape: f32[16,40], index: 0, kind: input, shape index: {}]   ;;  %s1027_s1 = inlined_call_operand.vmem [shape: f32[16,40], index: 1, kind: input, shape index: {}]   ;;  %s1028_s2 = inlined_call_operand.vmem [shape: f32[128,40], index: 2, kind: input, shape index: {}]   ;;  %s1029_s3 = inlined_call_operand.vmem [shape: f32[16,1], index: 3, kind: output, shape index: {0}]   ;;  %s1030_s4 = inlined_call_operand.hbm [shape: f32[16,128], index: 4, kind: output, shape index: {1}]  }
   0x1   :  { %12 = vsyncpa [#allocation3 + $0x1], 0  ;;  %s831_s15 = smov 0   ;;  %s833_s16 = smov 0  }
   0x2   :  { %s835_s17 = smov 0   ;;  %s837_s18 = smov 0  }
   0x3   :  { %s839_s19 = smov 0   ;;  %s841_s20 = smov 0  }
   0x4 LB: > { %s549_s21 = sadd.s32 4294967295, %s800_s20   ;;  %s550_s22 = sadd.s32 4294967294, %s800_s20   ;;  %s800_s20 = sphi %s841_s20, %s18_s20   ;;  %s796_s19 = sphi %s839_s19, %s1039_s19   ;;  %s792_s18 = sphi %s837_s18, %s1038_s18   ;;  %s788_s17 = sphi %s835_s17, %s1037_s17   ;;  %s784_s16 = sphi %s833_s16, %s1036_s16   ;;  %s780_s15 = sphi %s831_s15, %s1035_s15  }
   0x5   : > { %s30_s23 = sadd.s32 1, %s796_s19  ;;  %s143_s24 = sadd.s32 1, %s788_s17 }
   0x6   : > { %p32_p0 = scmp.ge.s32.totalorder %s30_s23, 2  ;;  %p153_p1 = scmp.ne.s32.totalorder %s788_s17, %s784_s16 }
   0x7   : > { %p154_p2 = scmp.eq.s32.totalorder %s549_s21, 1  ;;  %p159_p3 = scmp.ne.s32.totalorder %s784_s16, %s780_s15 }
   0x8   : > { %s1041_s23 = smov (%p32_p0, %s30_s23), 0  ;;  %p160_p5 = scmp.eq.s32.totalorder %s550_s22, 1 }
   0x9   : > { %p871_p4 = por %p154_p2, %p153_p1  ;;  %s138_s26 = ssub.s32 %s796_s19, %s1041_s23 }
   0xa   : > { %p554_p6 = scmp.ge.s32.totalorder %s800_s20, 1  ;;  %p141_p7 = scmp.eq.s32.totalorder %s138_s26, 0 }
   0xb   : > { %p878_p8 = por %p160_p5, %p159_p3  ;;  %p201_p9 = scmp.lt.s32.totalorder %s800_s20, 3 }
   0xc   : > { %s884_s28 = scalar_select %p141_p7, %s788_s17, %s143_s24  }
   0xd   : > { %p202_p10 = pnand %p554_p6, %p201_p9 }
   0xe   : > { %v258_v0 = vld [vmem:[%s1028_s2] sm:$0xff] (!%p202_p10)  ;;  %v259_v1 = vld [vmem:[%s1028_s2 + $0x8] sm:$0xff] (!%p202_p10)  ;;  %vm274_vm0 = vcmask (!%p202_p10), 326656   ;;  %v802_v2 = vmov (!%p202_p10), 0.0|0.0   ;;  %p239_p11 = scmp.lt.s32.totalorder (!%p202_p10), %s792_s18, 1  ;;  %vm803_vm2 = vmmov (!%p202_p10), 0  }
   0xf   : > { %205 = sbr.rel (%p202_p10) target bundleno = 306 (0x132), region = 32  ;;  %632 = vmatprep.subr.bf16.mxu0 (!%p202_p10), %v802_v2  ;;  %v633_v3 = vpack.c.bf16 (!%p202_p10), %v259_v1, %v258_v0  ;;  %vm894_vm1 = vmpackc.low (!%p202_p10), %vm274_vm0, %vm274_vm0  ;;  %v804_v5 = vmov (!%p202_p10), 0.0   ;;  %v260_v6 = vld [vmem:[%s1028_s2 + $0x10] sm:$0xff] (!%p202_p10)  ;;  %v261_v7 = vld [vmem:[%s1028_s2 + $0x18] sm:$0xff] (!%p202_p10)  ;;  %vm406_vm3 = vcmask (!%p202_p10), 7168   ;;  %s236_s22 = sand.u32 (!%p202_p10), 1, %s784_s16  }
  0x10   : > { %629 = vmatprep.mubr.msk.f32.mxu0 (!%p202_p10), %vm803_vm2, %v804_v5  ;;  %v637_v8 = vpack.c.bf16 (!%p202_p10), %v261_v7, %v260_v6  ;;  %v262_v13 = vld [vmem:[%s1028_s2 + $0x20] sm:$0xff] (!%p202_p10)  ;;  %v263_v14 = vld [vmem:[%s1028_s2 + $0x28] sm:$0xff] (!%p202_p10)  ;;  %v264_v16 = vld [vmem:[%s1028_s2 + $0x30] sm:$0xff] (!%p202_p10)  ;;  %s555_s24 = sshll.u32 (!%p202_p10), %s236_s22, 3  ;;  %s577_s30 = sshll.u32 (!%p202_p10), %s792_s18, 7 }
  0x11   : > { %635 = vmatpush3.bf16.xpose.msk.msra.mxu0 (!%p202_p10), %vm894_vm1, %v633_v3  ;;  %v641_v15 = vpack.c.bf16 (!%p202_p10), %v263_v14, %v262_v13  ;;  %v265_v17 = vld [vmem:[%s1028_s2 + $0x38] sm:$0xff] (!%p202_p10)  ;;  %v266_v19 = vld [vmem:[%s1028_s2 + $0x40] sm:$0xff] (!%p202_p10)  ;;  %v267_v20 = vld [vmem:[%s1028_s2 + $0x48] sm:$0xff] (!%p202_p10) }
  0x12   : > { %636 = vmatprep.subr.bf16.mxu0 (!%p202_p10), %v802_v2  ;;  %v645_v18 = vpack.c.bf16 (!%p202_p10), %v265_v17, %v264_v16  ;;  %v649_v21 = vpack.c.bf16 (!%p202_p10), %v267_v20, %v266_v19  ;;  %v268_v22 = vld [vmem:[%s1028_s2 + $0x50] sm:$0xff] (!%p202_p10)  ;;  %v269_v23 = vld [vmem:[%s1028_s2 + $0x58] sm:$0xff] (!%p202_p10)  ;;  %v270_v25 = vld [vmem:[%s1028_s2 + $0x60] sm:$0xff] (!%p202_p10) }
  0x13   : > { %v653_v24 = vpack.c.bf16 (!%p202_p10), %v269_v23, %v268_v22  ;;  %v271_v26 = vld [vmem:[%s1028_s2 + $0x68] sm:$0xff] (!%p202_p10)  ;;  %v272_v28 = vld [vmem:[%s1028_s2 + $0x70] sm:$0xff] (!%p202_p10)  ;;  %v273_v29 = vld [vmem:[%s1028_s2 + $0x78] sm:$0xff] (!%p202_p10) }
  0x14   : > { %v657_v27 = vpack.c.bf16 (!%p202_p10), %v271_v26, %v270_v25  ;;  %v661_v30 = vpack.c.bf16 (!%p202_p10), %v273_v29, %v272_v28 }
  0x16   : > { %s240_s7 = scalar_select %p239_p11, %s792_s18, 1 }
  0x17   : > { %s805_s18 = smov [#allocation2]  }
  0x18   : > { %s908_s12 = sshll.u32 %s240_s7, 3  ;;  %s981_s7 = scalar_lea.hbm %s1030_s4, %s577_s30 }
  0x19   : > { %s242_s21 = scalar_lea.vmem %s1026_s0, %s908_s12  ;;  %s246_s26 = scalar_lea.vmem %s1027_s1, %s908_s12  ;;  %639 = vmatpush3.bf16.xpose.msk.msra.mxu0 %vm894_vm1, %v637_v8 }
  0x1a   : > { %v257_v9 = vld [vmem:[%s242_s21] sm:$0xff]  ;;  %640 = vmatprep.subr.bf16.mxu0 %v802_v2  ;;  %s256_s21 = scalar_lea.vmem %s1029_s3, %s908_s12  ;;  %s413_s12 = scalar_lea.sflag [#allocation3], %s236_s22 }
  0x1b   : > { %v401_v10 = vld [vmem:[%s246_s26] sm:$0xff]  ;;  %s238_s26 = scalar_lea.vmem [#allocation2], %s555_s24  ;;  %s726_s9 = sshll.u32 %s805_s18, 4  ;;  %s727_s9 = int_to_ptr.vmem [resolvable:$false] %s726_s9 }
  0x1c   : > { %v402_v11 = vmul.f32 %v401_v10, %v257_v9  ;;  %s430_s29 = sshll.u32 %s238_s26, 4  ;;  %s728_s10 = scalar_lea.vmem %s727_s9, 256  ;;  %s976_s29 = int_to_ptr.vmem [resolvable:$true] %s430_s29 }
  0x1d   : > { %s722_s8 = scalar_lea.vmem %s976_s29, 128  ;;  %p729_p1 = scmp.lt.s32.totalorder %s976_s29, %s727_s9 }
  0x1e   : > { %v403_v12 = vsel %vm274_vm0, %v402_v11, 0.0  ;;  %p723_p12 = scmp.ne.s32.totalorder %s976_s29, %s722_s8  ;;  %p730_p2 = scmp.lt.s32.totalorder %s728_s10, %s722_s8 }
  0x1f   : > { %404 = vadd.xlane.f32.xlu0 %v403_v12 }
  0x20   : > { %p724_p13 = pnand %p723_p12, %p871_p4  ;;  %p731_p3 = por %p730_p2, %p729_p1 }
  0x21   : > { %643 = vmatpush3.bf16.xpose.msk.msra.mxu0 %vm894_vm1, %v641_v15 }
  0x22   : > { %644 = vmatprep.subr.bf16.mxu0 %v802_v2  ;;  %p725_p0 = pneg %p724_p13 }
  0x24   : > { %p732_p5 = pnand %p731_p3, %p725_p0 }
  0x29   : > { %647 = vmatpush3.bf16.xpose.msk.msra.mxu0 %vm894_vm1, %v645_v18 }
  0x2a   : > { %648 = vmatprep.subr.bf16.mxu0 %v802_v2 }
  0x31   : > { %651 = vmatpush3.bf16.xpose.msk.msra.mxu0 %vm894_vm1, %v649_v21 }
  0x32   : > { %652 = vmatprep.subr.bf16.mxu0 %v802_v2 }
  0x39   : > { %655 = vmatpush3.bf16.xpose.msk.msra.mxu0 %vm894_vm1, %v653_v24 }
  0x3a   : > { %656 = vmatprep.subr.bf16.mxu0 %v802_v2 }
  0x41   : > { %659 = vmatpush3.bf16.xpose.msk.msra.mxu0 %vm894_vm1, %v657_v27 }
  0x42   : > { %660 = vmatprep.subr.bf16.mxu0 %v802_v2 }
  0x49   : > { %663 = vmatpush3.bf16.xpose.msk.msra.mxu0 %vm894_vm1, %v661_v30 }
  0x50   : > { %630 = vmatmul.mubr.msk.f32.vlgmr.msra.gmra.mrb[0].mxu0 %vm274_vm0, %v257_v9 }
  0xac   : > { %v405_v31 = vpop.xlane.xlu0 %404 }
  0xad   : > { %407 = vst.msk [vmem:[%s256_s21] sm:$0xff] %vm406_vm3, %v405_v31 }
 0x123   : > { %v392_v32 = vpop.f32.mrb[0].mxu0 }
 0x124   : > { %396 = vst [vmem:[%s238_s26] sm:$0xff] %v392_v32  ;;  %v631_v33 = vpop.f32.mrb[1].mxu0 }
 0x125   : > { %735 = shalt.err (!%p732_p5)
}
 0x126   : > { %s736_s11 = scalar_lea.hbm %s981_s7, 128  ;;  %s740_s21 = scalar_lea.hbm %s1030_s4, 256 }
 0x127   : > { %p737_p6 = scmp.ne.s32.totalorder %s981_s7, %s736_s11  ;;  %p741_p10 = scmp.lt.u32.totalorder %s981_s7, %s1030_s4 }
 0x128   : > { %p742_p11 = scmp.lt.u32.totalorder %s740_s21, %s736_s11  ;;  %p744_p13 = scmp.lt.u32.totalorder %s736_s11, %s981_s7 }
 0x129   : > { %p738_p7 = pnand %p737_p6, %p871_p4 }
 0x12a   : > { %p743_p12 = por %p742_p11, %p741_p10 }
 0x12b   : > { %p739_p9 = pneg %p738_p7 }
 0x12c   : > { %p745_p0 = por %p744_p13, %p743_p12 }
 0x12e   : > { %p746_p1 = pnand %p745_p0, %p739_p9 }
 0x130   : > { %749 = shalt.err (!%p746_p1)
}
 0x131   : > { %664 = dma.vmem_to_hbm [thread:$0]  (%p871_p4), %s976_s29, 128, %s981_s7, %s413_s12  }
 0x132 PF: > { %p670_p2 = scmp.ge.s32.totalorder %s800_s20, 2  ;;  %s449_s26 = sand.u32 1, %s780_s15  }
 0x133   : > { %s450_s30 = scalar_lea.sflag [#allocation3], %s449_s26 }
 0x134   : > { %p667_p3 = pnand %p670_p2, %p878_p8 }
 0x136   : > { %775 = dma.done.wait (!%p667_p3), %s450_s30, 128  }
 0x137   : > { %777 = vsyncadd (!%p667_p3), %s450_s30, 4294967168  ;;  %s18_s20 = sadd.s32 1, %s800_s20   ;;  %s1035_s15 = smov %s784_s16 }
 0x138   : > { %p15_p5 = scmp.ge.s32.totalorder %s18_s20, 4   ;;  %s1036_s16 = smov %s788_s17 }
 0x139   : > { %s1037_s17 = smov %s884_s28  ;;  %s1038_s18 = smov %s796_s19 }
 0x13a   : > { %s1039_s19 = smov %s1041_s23  ;;  %17 = sbr.rel (!%p15_p5) target bundleno = 4 (0x4), region = 89 }
 0x141   :  { %455 = vsyncpa [#allocation3], 1 }
 0x142   :  { %457 = vsyncpa [#allocation3 + $0x1], 1 }

</bundles_post_ra>
